<compile_context>
chip_gen: v7x
topology: tpu7x:2x2x1
jax: 0.10.0
libtpu: 0.0.40
codegen_flags: <defaults>
</compile_context>

<pallas_src>
import math

import jax
import jax.numpy as jnp
from jax.experimental import pallas as pl
from jax.experimental.pallas import tpu as pltpu

# fixed-embedding table sizes (TemporalEmbedding, freq='h')
NUM_HOUR, NUM_WEEKDAY, NUM_DAY, NUM_MONTH = 24, 7, 32, 13
TBL = NUM_HOUR + NUM_WEEKDAY + NUM_DAY + NUM_MONTH  # 76
PAD_TBL = 128                                       # pad contraction dim to native MXU K
# NOTE: these offset ranges are disjoint — required for the OR'd multi-hot trick below.
OFF_HOUR, OFF_WEEKDAY, OFF_DAY, OFF_MONTH = 0, 24, 31, 63


def data_embedding_kernel(x3_ref, mark_ref, w_ref, tbl_ref, o_ref):
    # x3_ref:  (1, TL, 3C) f32   [x_prev | x | x_next] (circular shift done in wrapper)
    # mark_ref:(1, TL, 4)  i32   [month, day, weekday, hour]
    # w_ref:   (3C, D)     f32   stacked conv taps (resident)
    # tbl_ref: (128, D)    f32   concatenated fixed tables, zero-padded rows 76..127 (resident)
    # o_ref:   (1, TL, D)
    tl = x3_ref.shape[1]

    # --- TokenEmbedding: circular Conv1d(k=3, pad=1, bias=False) as one matmul ---
    y = jnp.dot(x3_ref[0], w_ref[...], preferred_element_type=jnp.float32)

    # --- TemporalEmbedding (fixed, freq='h'): hour + weekday + day + month ---
    # multi-hot (TL, 128) built with one OR chain + one cast; ranges are disjoint.
    mark = mark_ref[0]                                                 # (TL, 4) i32
    iota = jax.lax.broadcasted_iota(jnp.int32, (tl, PAD_TBL), 1)
    hit = (iota == (mark[:, 3:4] + OFF_HOUR))
    hit = hit | (iota == (mark[:, 2:3] + OFF_WEEKDAY))
    hit = hit | (iota == (mark[:, 1:2] + OFF_DAY))
    hit = hit | (iota == (mark[:, 0:1] + OFF_MONTH))
    y = y + jnp.dot(hit.astype(jnp.float32), tbl_ref[...],
                    preferred_element_type=jnp.float32)

    # TODO(synk): nn.Dropout treated as identity (inference mode, no RNG mask applied).
    o_ref[0] = y.astype(o_ref.dtype)


def _choose_tile_len(L, target):
    """Largest multiple-of-8 divisor of L that is <= target; else the full L."""
    if L <= target:
        return L
    best = None
    for tl in range(8, target + 1, 8):
        if L % tl == 0:
            best = tl
    return best if best is not None else L


def data_embedding_wo_pos(x, x_mark, conv_w, tables, *, tl_target=1024):
    """x: (B, L, C) f32, x_mark: (B, L, 4) int [month, day, weekday, hour],
    conv_w: (D, C, 3) f32 (torch Conv1d layout),
    tables: (hour, weekday, day, month) fixed sinusoidal tables, each (size, D)."""
    B, L, C = x.shape
    D = conv_w.shape[0]
    TL = _choose_tile_len(L, tl_target)
    n_l = L // TL

    # Circular-conv taps concatenated on the channel axis: (B, L, 3C).
    # (x is the tiny operand — C channels — so the 3x read traffic is negligible vs the
    #  (B, L, D) output; it removes all in-kernel rolls and any halo handling.)
    x_f32 = x.astype(jnp.float32)
    x3 = jnp.concatenate(
        [jnp.roll(x_f32, 1, axis=1), x_f32, jnp.roll(x_f32, -1, axis=1)], axis=-1)

    # Conv weight flattened to (3C, D): rows [kC:(k+1)C) = tap k, transposed.
    w2d = jnp.concatenate([conv_w[:, :, k].T for k in range(3)], axis=0).astype(jnp.float32)

    # Fixed tables concatenated (76, D) then zero-padded to (128, D).
    tbl = jnp.concatenate(tables, axis=0).astype(jnp.float32)
    tbl = jnp.pad(tbl, ((0, PAD_TBL - TBL), (0, 0)))

    mark = x_mark.astype(jnp.int32)

    flops = 2 * B * L * (3 * C + PAD_TBL) * D
    bytes_accessed = 4 * (x3.size + mark.size + w2d.size + tbl.size + B * L * D)
    cost = pl.CostEstimate(flops=flops, transcendentals=0, bytes_accessed=bytes_accessed)

    return pl.pallas_call(
        data_embedding_kernel,
        out_shape=jax.ShapeDtypeStruct((B, L, D), x.dtype),
        grid=(B, n_l),
        in_specs=[
            pl.BlockSpec((1, TL, 3 * C), lambda b, l: (b, l, 0)),
            pl.BlockSpec((1, TL, 4), lambda b, l: (b, l, 0)),
            pl.BlockSpec((3 * C, D), lambda b, l: (0, 0)),      # resident weight
            pl.BlockSpec((PAD_TBL, D), lambda b, l: (0, 0)),    # resident table
        ],
        out_specs=pl.BlockSpec((1, TL, D), lambda b, l: (b, l, 0)),
        compiler_params=pltpu.CompilerParams(
            dimension_semantics=("parallel", "parallel"),
            vmem_limit_bytes=48 * 1024 * 1024,   # safe under v7x's 64 MiB physical VMEM
        ),
        cost_estimate=cost,
    )(x3, mark, w2d, tbl)


# ------------------------- parameter construction -------------------------

def fixed_embedding_table(c_in, d_model):
    """Same math as FixedEmbedding.__init__ (sinusoidal, non-trainable)."""
    pos = jnp.arange(c_in, dtype=jnp.float32)[:, None]
    div = jnp.exp(jnp.arange(0, d_model, 2, dtype=jnp.float32)
                  * (-(math.log(10000.0) / d_model)))
    w = jnp.zeros((c_in, d_model), jnp.float32)
    w = w.at[:, 0::2].set(jnp.sin(pos * div))
    w = w.at[:, 1::2].set(jnp.cos(pos * div))
    return w


def init_conv_weight(key, c_in, d_model):
    """kaiming_normal_(mode='fan_in', nonlinearity='leaky_relu', slope=0.01)."""
    fan_in = c_in * 3
    gain = math.sqrt(2.0 / (1.0 + 0.01 ** 2))
    std = gain / math.sqrt(fan_in)
    return std * jax.random.normal(key, (d_model, c_in, 3), jnp.float32)


# ------------------------------ reference ---------------------------------

def ref_forward(x, x_mark, conv_w, tables):
    B, L, C = x.shape
    xp = jnp.concatenate([x[:, -1:], x, x[:, :1]], axis=1)  # circular pad=1
    y = jnp.zeros((B, L, conv_w.shape[0]), jnp.float32)
    for k in range(3):
        y = y + jnp.einsum('blc,dc->bld', xp[:, k:k + L], conv_w[:, :, k])
    hour, weekday, day, month = tables
    temporal = (hour[x_mark[..., 3]] + weekday[x_mark[..., 2]]
                + day[x_mark[..., 1]] + month[x_mark[..., 0]])
    return y + temporal


def make_inputs(key, B, L, C_IN):
    k_x, k_mo, k_dy, k_wd, k_hr = jax.random.split(key, 5)
    x = jax.random.normal(k_x, (B, L, C_IN), jnp.float32)
    x_mark = jnp.stack([
        jax.random.randint(k_mo, (B, L), 0, NUM_MONTH),    # month
        jax.random.randint(k_dy, (B, L), 0, NUM_DAY),      # day
        jax.random.randint(k_wd, (B, L), 0, NUM_WEEKDAY),  # weekday
        jax.random.randint(k_hr, (B, L), 0, NUM_HOUR),     # hour
    ], axis=-1).astype(jnp.int32)                          # (B, L, 4)
    return x, x_mark


if __name__ == "__main__":
    B, L, C_IN, D_MODEL = 2, 8, 4, 32

    key = jax.random.PRNGKey(0)
    k_in, k_w, k_in2 = jax.random.split(key, 3)

    conv_w = init_conv_weight(k_w, C_IN, D_MODEL)          # (D, C, 3)
    tables = (fixed_embedding_table(NUM_HOUR, D_MODEL),
              fixed_embedding_table(NUM_WEEKDAY, D_MODEL),
              fixed_embedding_table(NUM_DAY, D_MODEL),
              fixed_embedding_table(NUM_MONTH, D_MODEL))

    # small shape (single L tile)
    x, x_mark = make_inputs(k_in, B, L, C_IN)
    out = jax.block_until_ready(data_embedding_wo_pos(x, x_mark, conv_w, tables))
    ref = ref_forward(x, x_mark, conv_w, tables)
    assert out.shape == (B, L, D_MODEL)
    assert jnp.allclose(out, ref, atol=5e-3, rtol=5e-3), "mismatch vs pure-JAX reference"

    # multi-tile path (exercises the L tiling + circular boundary across tiles)
    L2 = 256
    x2, x_mark2 = make_inputs(k_in2, B, L2, C_IN)
    out2 = jax.block_until_ready(
        data_embedding_wo_pos(x2, x_mark2, conv_w, tables, tl_target=64))
    ref2 = ref_forward(x2, x_mark2, conv_w, tables)
    assert out2.shape == (B, L2, D_MODEL)
    assert jnp.allclose(out2, ref2, atol=5e-3, rtol=5e-3), "mismatch (tiled) vs reference"

    print("KERNEL_OK")
</pallas_src>

<mosaic_0001>
module attributes {stable_mosaic.version = 11 : i64} {
  func.func @data_embedding_kernel(%arg0: i32, %arg1: i32, %arg2: memref<1x8x12xf32, #tpu.memory_space<vmem>>, %arg3: memref<1x8x4xi32, #tpu.memory_space<vmem>>, %arg4: memref<12x32xf32, #tpu.memory_space<vmem>>, %arg5: memref<128x32xf32, #tpu.memory_space<vmem>>, %arg6: memref<1x8x32xf32, #tpu.memory_space<vmem>>) attributes {dimension_semantics = [#tpu.dimension_semantics<parallel>, #tpu.dimension_semantics<parallel>], iteration_bounds = array<i64: 2, 1>, scalar_prefetch = 0 : i64, scratch_operands = 0 : i64, tpu.core_type = #tpu.core_type<tc>, window_params = [{transform_indices = @transform_0, window_bounds = array<i64: 1, 8, 12>}, {transform_indices = @transform_1, window_bounds = array<i64: 1, 8, 4>}, {pipeline_mode = #tpu.pipeline_mode<synchronous>, transform_indices = @transform_2, window_bounds = array<i64: 12, 32>}, {pipeline_mode = #tpu.pipeline_mode<synchronous>, transform_indices = @transform_3, window_bounds = array<i64: 128, 32>}, {transform_indices = @transform_4, window_bounds = array<i64: 1, 8, 32>}]} {
    %c0 = arith.constant 0 : index
    %c0_0 = arith.constant 0 : index
    %c0_1 = arith.constant 0 : index
    %0 = vector.load %arg2[%c0, %c0_0, %c0_1] : memref<1x8x12xf32, #tpu.memory_space<vmem>>, vector<1x8x12xf32>
    %1 = vector.shape_cast %0 : vector<1x8x12xf32> to vector<8x12xf32>
    %c0_2 = arith.constant 0 : index
    %c0_3 = arith.constant 0 : index
    %2 = vector.load %arg4[%c0_2, %c0_3] : memref<12x32xf32, #tpu.memory_space<vmem>>, vector<12x32xf32>
    %cst = arith.constant dense<0.000000e+00> : vector<8x32xf32>
    %3 = tpu.matmul %1, %2, %cst {dimension_numbers = #tpu.dot_dimension_numbers<[1], [0], [0], [1], [0, 0, 1, 1], [], []>} : vector<8x12xf32>, vector<12x32xf32>, vector<8x32xf32> -> vector<8x32xf32>
    %c0_4 = arith.constant 0 : index
    %c0_5 = arith.constant 0 : index
    %c0_6 = arith.constant 0 : index
    %4 = vector.load %arg3[%c0_4, %c0_5, %c0_6] : memref<1x8x4xi32, #tpu.memory_space<vmem>>, vector<1x8x4xi32>
    %5 = vector.shape_cast %4 : vector<1x8x4xi32> to vector<8x4xi32>
    %6 = tpu.iota {dimensions = array<i32: 1>} : vector<8x128xi32>
    %7 = vector.extract_strided_slice %5 {offsets = [0, 3], sizes = [8, 1], strides = [1, 1]} : vector<8x4xi32> to vector<8x1xi32>
    %c0_i32 = arith.constant 0 : i32
    %8 = vector.broadcast %c0_i32 : i32 to vector<8x1xi32>
    %9 = arith.addi %7, %8 : vector<8x1xi32>
    %10 = vector.broadcast %9 : vector<8x1xi32> to vector<8x128xi32>
    %11 = arith.cmpi eq, %6, %10 : vector<8x128xi32>
    %12 = vector.extract_strided_slice %5 {offsets = [0, 2], sizes = [8, 1], strides = [1, 1]} : vector<8x4xi32> to vector<8x1xi32>
    %c24_i32 = arith.constant 24 : i32
    %13 = vector.broadcast %c24_i32 : i32 to vector<8x1xi32>
    %14 = arith.addi %12, %13 : vector<8x1xi32>
    %15 = vector.broadcast %14 : vector<8x1xi32> to vector<8x128xi32>
    %16 = arith.cmpi eq, %6, %15 : vector<8x128xi32>
    %17 = arith.ori %11, %16 : vector<8x128xi1>
    %18 = vector.extract_strided_slice %5 {offsets = [0, 1], sizes = [8, 1], strides = [1, 1]} : vector<8x4xi32> to vector<8x1xi32>
    %c31_i32 = arith.constant 31 : i32
    %19 = vector.broadcast %c31_i32 : i32 to vector<8x1xi32>
    %20 = arith.addi %18, %19 : vector<8x1xi32>
    %21 = vector.broadcast %20 : vector<8x1xi32> to vector<8x128xi32>
    %22 = arith.cmpi eq, %6, %21 : vector<8x128xi32>
    %23 = arith.ori %17, %22 : vector<8x128xi1>
    %24 = vector.extract_strided_slice %5 {offsets = [0, 0], sizes = [8, 1], strides = [1, 1]} : vector<8x4xi32> to vector<8x1xi32>
    %c63_i32 = arith.constant 63 : i32
    %25 = vector.broadcast %c63_i32 : i32 to vector<8x1xi32>
    %26 = arith.addi %24, %25 : vector<8x1xi32>
    %27 = vector.broadcast %26 : vector<8x1xi32> to vector<8x128xi32>
    %28 = arith.cmpi eq, %6, %27 : vector<8x128xi32>
    %29 = arith.ori %23, %28 : vector<8x128xi1>
    %30 = arith.extui %29 : vector<8x128xi1> to vector<8x128xi32>
    %31 = arith.sitofp %30 : vector<8x128xi32> to vector<8x128xf32>
    %c0_7 = arith.constant 0 : index
    %c0_8 = arith.constant 0 : index
    %32 = vector.load %arg5[%c0_7, %c0_8] : memref<128x32xf32, #tpu.memory_space<vmem>>, vector<128x32xf32>
    %cst_9 = arith.constant dense<0.000000e+00> : vector<8x32xf32>
    %33 = tpu.matmul %31, %32, %cst_9 {dimension_numbers = #tpu.dot_dimension_numbers<[1], [0], [0], [1], [0, 0, 1, 1], [], []>} : vector<8x128xf32>, vector<128x32xf32>, vector<8x32xf32> -> vector<8x32xf32>
    %34 = arith.addf %3, %33 : vector<8x32xf32>
    %c0_10 = arith.constant 0 : index
    %c0_11 = arith.constant 0 : index
    %c0_12 = arith.constant 0 : index
    %35 = vector.load %arg6[%c0_10, %c0_11, %c0_12] : memref<1x8x32xf32, #tpu.memory_space<vmem>>, vector<1x8x32xf32>
    %36 = vector.shape_cast %35 : vector<1x8x32xf32> to vector<8x32xf32>
    %37 = vector.shape_cast %34 : vector<8x32xf32> to vector<1x8x32xf32>
    tpu.vector_store %arg6[%c0_10, %c0_11, %c0_12], %37 {strides = array<i32>} : memref<1x8x32xf32, #tpu.memory_space<vmem>>, vector<1x8x32xf32>,
    return
  }
  func.func @transform_0(%arg0: i32, %arg1: i32) -> (i32, i32, i32) {
    %c0_i32 = arith.constant 0 : i32
    %c0_i32_0 = arith.constant 0 : i32
    return %arg0, %arg1, %c0_i32 : i32, i32, i32
  }
  func.func @transform_1(%arg0: i32, %arg1: i32) -> (i32, i32, i32) {
    %c0_i32 = arith.constant 0 : i32
    %c0_i32_0 = arith.constant 0 : i32
    return %arg0, %arg1, %c0_i32 : i32, i32, i32
  }
  func.func @transform_2(%arg0: i32, %arg1: i32) -> (i32, i32) {
    %c0_i32 = arith.constant 0 : i32
    %c0_i32_0 = arith.constant 0 : i32
    %c0_i32_1 = arith.constant 0 : i32
    return %c0_i32, %c0_i32_0 : i32, i32
  }
  func.func @transform_3(%arg0: i32, %arg1: i32) -> (i32, i32) {
    %c0_i32 = arith.constant 0 : i32
    %c0_i32_0 = arith.constant 0 : i32
    %c0_i32_1 = arith.constant 0 : i32
    return %c0_i32, %c0_i32_0 : i32, i32
  }
  func.func @transform_4(%arg0: i32, %arg1: i32) -> (i32, i32, i32) {
    %c0_i32 = arith.constant 0 : i32
    %c0_i32_0 = arith.constant 0 : i32
    return %arg0, %arg1, %c0_i32 : i32, i32, i32
  }
}

</mosaic_0001>

<bundles_post_ra>
// kernel: tpu_custom_call.1
= control target key start
LH: loop header
LB: loop body
LE: loop exit
PB: predicated region body
PF: predicated region fallthrough
CT: control target
= control target key end

     0   :  { %9 = vsyncpa [#allocation3], 0  ;;  %s1019_s0 = inlined_call_operand.vmem [shape: f32[2,8,12], index: 0, kind: input, shape index: {}]   ;;  %s1020_s1 = inlined_call_operand.vmem [shape: s32[2,8,4], index: 1, kind: input, shape index: {}]   ;;  %s1021_s2 = inlined_call_operand.vmem [shape: f32[12,32], index: 2, kind: input, shape index: {}]   ;;  %s1022_s3 = inlined_call_operand.vmem [shape: f32[128,32], index: 3, kind: input, shape index: {}]   ;;  %s1023_s4 = inlined_call_operand.hbm [shape: f32[2,8,32], index: 4, kind: output, shape index: {}]  }
   0x1   :  { %11 = vsyncpa [#allocation3 + $0x1], 0  ;;  %s834_s15 = smov 0   ;;  %s836_s16 = smov 0  }
   0x2   :  { %s838_s17 = smov 0   ;;  %s840_s18 = smov 0  }
   0x3   :  { %s842_s19 = smov 0   ;;  %s844_s20 = smov 0  }
   0x4 LB: > { %s543_s21 = sadd.s32 4294967295, %s797_s20   ;;  %s544_s22 = sadd.s32 4294967294, %s797_s20   ;;  %s797_s20 = sphi %s844_s20, %s17_s20   ;;  %s793_s19 = sphi %s842_s19, %s1030_s19   ;;  %s789_s18 = sphi %s840_s18, %s1029_s18   ;;  %s785_s17 = sphi %s838_s17, %s1028_s17   ;;  %s781_s16 = sphi %s836_s16, %s1027_s16   ;;  %s777_s15 = sphi %s834_s15, %s1026_s15  }
   0x5   : > { %s29_s23 = sadd.s32 1, %s793_s19  ;;  %s136_s24 = sadd.s32 1, %s785_s17 }
   0x6   : > { %p31_p0 = scmp.ge.s32.totalorder %s29_s23, 2  ;;  %p146_p1 = scmp.ne.s32.totalorder %s785_s17, %s781_s16 }
   0x7   : > { %p147_p2 = scmp.eq.s32.totalorder %s543_s21, 1  ;;  %p152_p3 = scmp.ne.s32.totalorder %s781_s16, %s777_s15 }
   0x8   : > { %s1032_s23 = smov (%p31_p0, %s29_s23), 0  ;;  %p153_p5 = scmp.eq.s32.totalorder %s544_s22, 1 }
   0x9   : > { %p874_p4 = por %p147_p2, %p146_p1  ;;  %s131_s26 = ssub.s32 %s793_s19, %s1032_s23 }
   0xa   : > { %p547_p6 = scmp.ge.s32.totalorder %s797_s20, 1  ;;  %p134_p7 = scmp.eq.s32.totalorder %s131_s26, 0 }
   0xb   : > { %p881_p8 = por %p153_p5, %p152_p3  ;;  %p197_p9 = scmp.lt.s32.totalorder %s797_s20, 3 }
   0xc   : > { %s887_s28 = scalar_select %p134_p7, %s785_s17, %s136_s24  }
   0xd   : > { %p198_p10 = pnand %p547_p6, %p197_p9 }
   0xe   : > { %p232_p11 = scmp.lt.s32.totalorder (!%p198_p10), %s789_s18, 1  ;;  %v276_v0 = vld [vmem:[%s1022_s3] sm:$0xff] (!%p198_p10)  ;;  %v799_v1 = vmov (!%p198_p10), 3   ;;  %v800_v2 = vmov (!%p198_p10), 1   ;;  %v277_v3 = vld [vmem:[%s1022_s3 + $0x8] sm:$0xff] (!%p198_p10)  ;;  %v278_v4 = vld [vmem:[%s1022_s3 + $0x10] sm:$0xff] (!%p198_p10)  ;;  %v250_v38 = vlaneseq (!%p198_p10) }
   0xf   : > { %201 = sbr.rel (%p198_p10) target bundleno = 392 (0x188), region = 36  ;;  %714 = vset.pattern.permute.xlu0 (!%p198_p10), %v799_v1  ;;  %716 = vset.pattern.permute.xlu1 (!%p198_p10), %v800_v2  ;;  %v279_v5 = vld [vmem:[%s1022_s3 + $0x18] sm:$0xff] (!%p198_p10)  ;;  %v801_v6 = vmov (!%p198_p10), 0.0|0.0   ;;  %v622_v7 = vpack.c.bf16 (!%p198_p10), %v277_v3, %v276_v0  ;;  %v280_v9 = vld [vmem:[%s1022_s3 + $0x20] sm:$0xff] (!%p198_p10)  ;;  %v281_v10 = vld [vmem:[%s1022_s3 + $0x28] sm:$0xff] (!%p198_p10)  ;;  %vm366_vm0 = vcmask (!%p198_p10), 1043456  }
  0x10   : > { %621 = vmatprep.subr.bf16.mxu1 (!%p198_p10), %v801_v6  ;;  %645 = vmatprep.subr.bf16.mxu0 (!%p198_p10), %v801_v6  ;;  %v625_v8 = vpack.c.bf16 (!%p198_p10), %v279_v5, %v278_v4  ;;  %v628_v14 = vpack.c.bf16 (!%p198_p10), %v281_v10, %v280_v9  ;;  %v282_v15 = vld [vmem:[%s1022_s3 + $0x30] sm:$0xff] (!%p198_p10)  ;;  %v283_v16 = vld [vmem:[%s1022_s3 + $0x38] sm:$0xff] (!%p198_p10)  ;;  %v247_v17 = vld [vmem:[%s1021_s2] sm:$0xff] (!%p198_p10)  ;;  %v802_v21 = vmov (!%p198_p10), 2   ;;  %vm803_vm1 = vmmov (!%p198_p10), 1   ;;  %s229_s24 = sand.u32 (!%p198_p10), 1, %s781_s16  }
  0x11   : > { %623 = vmatpush3.bf16.msra.mxu1 (!%p198_p10), %v622_v7  ;;  %v248_v18 = vld [vmem:[%s1021_s2 + $0x8] sm:$0xf] (!%p198_p10)  ;;  %vm647_vm2 = vmpackc.low (!%p198_p10), %vm366_vm0, %vm803_vm1  ;;  %v631_v22 = vpack.c.bf16 (!%p198_p10), %v283_v16, %v282_v15  ;;  %v804_v23 = vmov (!%p198_p10), 0   ;;  %v284_v24 = vld [vmem:[%s1022_s3 + $0x40] sm:$0xff] (!%p198_p10)  ;;  %vm362_vm3 = vcmask (!%p198_p10), 97280   ;;  %vm805_vm4 = vmmov (!%p198_p10), 0  }
  0x12   : > { %624 = vmatprep.subr.bf16.mxu1 (!%p198_p10), %v801_v6  ;;  %v646_v20 = vpack.c.bf16 (!%p198_p10), %v248_v18, %v247_v17  ;;  %v285_v25 = vld [vmem:[%s1022_s3 + $0x48] sm:$0xff] (!%p198_p10)  ;;  %v806_v27 = vmov (!%p198_p10), 0.0   ;;  %v286_v29 = vld [vmem:[%s1022_s3 + $0x50] sm:$0xff] (!%p198_p10)  ;;  %v287_v30 = vld [vmem:[%s1022_s3 + $0x58] sm:$0xff] (!%p198_p10)  ;;  %v251_v40 = vand.u32 (!%p198_p10), 127, %v250_v38  ;;  %v807_v44 = vmov (!%p198_p10), 1.0  }
  0x13   : > { %618 = vmatprep.mubr.msk.f32.mxu0 (!%p198_p10), %vm805_vm4, %v806_v27  ;;  %611 = vmatprep.mubr.msk.f32.mxu1 (!%p198_p10), %vm805_vm4, %v806_v27  ;;  %v634_v28 = vpack.c.bf16 (!%p198_p10), %v285_v25, %v284_v24  ;;  %v637_v31 = vpack.c.bf16 (!%p198_p10), %v287_v30, %v286_v29  ;;  %v288_v32 = vld [vmem:[%s1022_s3 + $0x60] sm:$0xff] (!%p198_p10)  ;;  %v289_v33 = vld [vmem:[%s1022_s3 + $0x68] sm:$0xff] (!%p198_p10)  ;;  %v290_v35 = vld [vmem:[%s1022_s3 + $0x70] sm:$0xff] (!%p198_p10)  ;;  %s548_s26 = sshll.u32 (!%p198_p10), %s229_s24, 3  ;;  %s556_s29 = sshll.u32 (!%p198_p10), %s789_s18, 7  ;;  %vm440_vm12 = vcmask (!%p198_p10), 261120  }
  0x14   : > { %648 = vmatpush3.bf16.msk.msra.mxu0 (!%p198_p10), %vm647_vm2, %v646_v20  ;;  %v640_v34 = vpack.c.bf16 (!%p198_p10), %v289_v33, %v288_v32  ;;  %v291_v36 = vld [vmem:[%s1022_s3 + $0x78] sm:$0xff] (!%p198_p10)  ;;  %s972_s7 = scalar_lea.hbm (!%p198_p10), %s1023_s4, %s556_s29 }
  0x15   : > { %626 = vmatpush3.bf16.msra.mxu1 (!%p198_p10), %v625_v8  ;;  %v643_v37 = vpack.c.bf16 (!%p198_p10), %v291_v36, %v290_v35 }
  0x16   : > { %s903_s11 = scalar_select %p232_p11, %s789_s18, 1  ;;  %627 = vmatprep.subr.bf16.mxu1 %v801_v6 }
  0x17   : > { %s808_s18 = smov [#allocation2]  }
  0x18   : > { %s549_s12 = sshll.u32 %s903_s11, 3  ;;  %s723_s9 = sshll.u32 %s808_s18, 4  ;;  %s724_s9 = int_to_ptr.vmem [resolvable:$false] %s723_s9 }
  0x19   : > { %s245_s21 = scalar_lea.vmem %s1020_s1, %s549_s12  ;;  %629 = vmatpush3.bf16.msra.mxu1 %v628_v14  ;;  %s238_s30 = scalar_lea.vmem %s1019_s0, %s549_s12 }
  0x1a   : > { %v249_v11 = vld [vmem:[%s245_s21] sm:$0xff]  ;;  %630 = vmatprep.subr.bf16.mxu1 %v801_v6  ;;  %s443_s12 = scalar_lea.sflag [#allocation3], %s229_s24  ;;  %s725_s10 = scalar_lea.vmem %s724_s9, 256 }
  0x1b   : > { %253 = vperm.xlu0 %714, %v249_v11   ;;  %v262_v12 = vadd.s32 31, %v249_v11  ;;  %v256_v13 = vadd.s32 24, %v249_v11  ;;  %v268_v19 = vadd.s32 63, %v249_v11  ;;  %v246_v26 = vld [vmem:[%s238_s30] sm:$0xff]  ;;  %s231_s30 = scalar_lea.vmem [#allocation2], %s548_s26 }
  0x1c   : > { %619 = vmatmul.mubr.msk.f32.vlgmr.msra.gmra.mrb[0].mxu0 %vm362_vm3, %v246_v26  ;;  %s457_s5 = sshll.u32 %s231_s30, 4  ;;  %s974_s5 = int_to_ptr.vmem [resolvable:$true] %s457_s5 }
  0x1d   : > { %264 = vperm.xlu1 %716, %v262_v12   ;;  %632 = vmatpush3.bf16.msra.mxu1 %v631_v22  ;;  %s719_s8 = scalar_lea.vmem %s974_s5, 128  ;;  %p726_p1 = scmp.lt.s32.totalorder %s974_s5, %s724_s9 }
  0x1e   : > { %633 = vmatprep.subr.bf16.mxu1 %v801_v6  ;;  %p720_p12 = scmp.ne.s32.totalorder %s974_s5, %s719_s8  ;;  %p727_p2 = scmp.lt.s32.totalorder %s725_s10, %s719_s8 }
  0x1f   : > { %715 = vset.pattern.permute.xlu0 %v802_v21 }
  0x20   : > { %258 = vperm.xlu0 %715, %v256_v13   ;;  %p721_p13 = pnand %p720_p12, %p874_p4  ;;  %p728_p3 = por %p727_p2, %p726_p1 }
  0x21   : > { %717 = vset.pattern.permute.xlu1 %v804_v23  ;;  %635 = vmatpush3.bf16.msra.mxu1 %v634_v28 }
  0x22   : > { %270 = vperm.xlu1 %717, %v268_v19   ;;  %636 = vmatprep.subr.bf16.mxu1 %v801_v6  ;;  %p722_p0 = pneg %p721_p13 }
  0x24   : > { %718 = vset.pattern.permute.xlu0 %v804_v23  ;;  %p729_p5 = pnand %p728_p3, %p722_p0 }
  0x25   : > { %638 = vmatpush3.bf16.msra.mxu1 %v637_v31 }
  0x26   : > { %639 = vmatprep.subr.bf16.mxu1 %v801_v6 }
  0x29   : > { %641 = vmatpush3.bf16.msra.mxu1 %v640_v34 }
  0x2a   : > { %642 = vmatprep.subr.bf16.mxu1 %v801_v6 }
  0x2d   : > { %644 = vmatpush3.bf16.msra.mxu1 %v643_v37 }
  0x9a   : > { %v254_v39 = vpop.permute.xlu0 %253 }
  0x9b   : > { %vm255_vm5 = vcmp.eq.s32.totalorder %v251_v40, %v254_v39 }
  0x9c   : > { %v265_v41 = vpop.permute.xlu1 %264 }
  0x9d   : > { %vm266_vm7 = vcmp.eq.s32.totalorder %v251_v40, %v265_v41 }
  0x9f   : > { %v259_v42 = vpop.permute.xlu0 %258 }
  0xa0   : > { %vm260_vm6 = vcmp.eq.s32.totalorder %v251_v40, %v259_v42 }
  0xa1   : > { %vm261_vm8 = vmor %vm255_vm5, %vm260_vm6  ;;  %v271_v43 = vpop.permute.xlu1 %270 }
  0xa2   : > { %vm267_vm9 = vmor %vm261_vm8, %vm266_vm7  ;;  %vm272_vm10 = vcmp.eq.s32.totalorder %v251_v40, %v271_v43 }
  0xa3   : > { %vm273_vm11 = vmor %vm267_vm9, %vm272_vm10 }
  0xa4   : > { %612 = vmatmul.mubr.msk.f32.vlgmr.msra.gmra.mrb[0].mxu1 %vm273_vm11, %v807_v44 }
  0xef   : > { %v436_v45 = vpop.f32.mrb[0].mxu0 }
  0xf0   : > { %v620_v46 = vpop.f32.mrb[1].mxu0 }
 0x177   : > { %v358_v47 = vpop.f32.mrb[0].mxu1 }
 0x178   : > { %v437_v48 = vadd.f32 %v436_v45, %v358_v47  ;;  %v613_v49 = vpop.f32.mrb[1].mxu1 }
 0x17a   : > { %441 = vst.msk [vmem:[%s231_s30] sm:$0xff] %vm440_vm12, %v437_v48 }
 0x17b   : > { %732 = shalt.err (!%p729_p5)
}
 0x17c   : > { %s733_s13 = scalar_lea.hbm %s972_s7, 128  ;;  %s737_s22 = scalar_lea.hbm %s1023_s4, 256 }
 0x17d   : > { %p734_p6 = scmp.ne.s32.totalorder %s972_s7, %s733_s13  ;;  %p738_p10 = scmp.lt.u32.totalorder %s972_s7, %s1023_s4 }
 0x17e   : > { %p739_p11 = scmp.lt.u32.totalorder %s737_s22, %s733_s13  ;;  %p741_p13 = scmp.lt.u32.totalorder %s733_s13, %s972_s7 }
 0x17f   : > { %p735_p7 = pnand %p734_p6, %p874_p4 }
 0x180   : > { %p740_p12 = por %p739_p11, %p738_p10 }
 0x181   : > { %p736_p9 = pneg %p735_p7 }
 0x182   : > { %p742_p0 = por %p741_p13, %p740_p12 }
 0x184   : > { %p743_p1 = pnand %p742_p0, %p736_p9 }
 0x186   : > { %746 = shalt.err (!%p743_p1)
}
 0x187   : > { %650 = dma.vmem_to_hbm [thread:$0]  (%p874_p4), %s974_s5, 128, %s972_s7, %s443_s12  }
 0x188 PF: > { %p656_p2 = scmp.ge.s32.totalorder %s797_s20, 2  ;;  %s469_s29 = sand.u32 1, %s777_s15  }
 0x189   : > { %s470_s30 = scalar_lea.sflag [#allocation3], %s469_s29 }
 0x18a   : > { %p653_p3 = pnand %p656_p2, %p881_p8 }
 0x18c   : > { %772 = dma.done.wait (!%p653_p3), %s470_s30, 128  }
 0x18d   : > { %774 = vsyncadd (!%p653_p3), %s470_s30, 4294967168  ;;  %s17_s20 = sadd.s32 1, %s797_s20   ;;  %s1026_s15 = smov %s781_s16 }
 0x18e   : > { %p14_p5 = scmp.ge.s32.totalorder %s17_s20, 4   ;;  %s1027_s16 = smov %s785_s17 }
 0x18f   : > { %s1028_s17 = smov %s887_s28  ;;  %s1029_s18 = smov %s793_s19 }
 0x190   : > { %s1030_s19 = smov %s1032_s23  ;;  %16 = sbr.rel (!%p14_p5) target bundleno = 4 (0x4), region = 74 }
 0x197   :  { %475 = vsyncpa [#allocation3], 1 }
 0x198   :  { %477 = vsyncpa [#allocation3 + $0x1], 1 }

</bundles_post_ra>
